<compile_context>
chip_gen: v7x
topology: tpu7x:2x2x1
jax: 0.10.0
libtpu: 0.0.40
codegen_flags: <defaults>
</compile_context>

<pallas_src>
import jax
import jax.numpy as jnp
from jax import lax
from jax.experimental import pallas as pl
from jax.experimental.pallas import tpu as pltpu

EPS = 1e-5
_CIN_PAD = 8            # pad the 3 input channels up to 8 (sublane friendly)
_C1, _C2, _C3 = 64, 128, 1024


def _round_up(v, m):
    return ((v + m - 1) // m) * m


def _select_tiling(n_points, tile_n=None):
    """Pick (tile_n, n_pad, vmem_limit_bytes) from the TPU generation."""
    try:
        vmem = pltpu.get_tpu_info().vmem_capacity_bytes
    except Exception:                       # unknown part -> conservative (v7x)
        vmem = 64 * 1024 * 1024
    if vmem >= 100 * 1024 * 1024:           # v5e / v6e: 128 MiB physical VMEM
        cap, vmem_limit = 4096, 100 * 1024 * 1024
    else:                                   # v7x: 64 MiB physical VMEM
        cap, vmem_limit = 2048, 48 * 1024 * 1024
    if tile_n is None:
        n8 = _round_up(n_points, 8)
        tile_n = n8 if n8 <= cap else cap   # small N: grid collapses to (B, 1)
    if tile_n < n_points:
        assert tile_n % 128 == 0, "multi-tile tile_n must be lane-aligned"
    n_pad = _round_up(n_points, tile_n)
    return tile_n, n_pad, vmem_limit


def _row_mask(t, tile_n, n_valid):
    rows = t * tile_n + lax.broadcasted_iota(jnp.int32, (tile_n, 1), 0)
    return rows < n_valid


# ---------------------------------------------------------------------------
# Phase kernels.  grid = (B, T): batch "parallel", point-tile "arbitrary".
# x block is (1, 8, tile_n): channels on sublanes, points dense on lanes.
# ---------------------------------------------------------------------------
_CONTRACT_C = (((0,), (0,)), ((), ()))      # contract the channel (sublane) axis


def _make_bn2_stats_kernel(n_valid, tile_n, n_pad):
    """conv1(+bn1+relu) -> conv2 ; accumulate per-batch [sum, sumsq] of conv2."""
    needs_mask = n_pad != n_valid

    def kernel(x_ref, w1_ref, sh1_ref, w2_ref, s2_ref):
        t = pl.program_id(1)
        xt = x_ref[0]                                              # (8, tile_n)
        h1 = lax.dot_general(xt, w1_ref[...], _CONTRACT_C,
                             preferred_element_type=jnp.float32)   # (tile_n, 64)
        h1 = jnp.maximum(h1 + sh1_ref[...], 0.0)                   # bn1 scale folded in w1
        h2 = jnp.dot(h1.astype(w2_ref.dtype), w2_ref[...],
                     preferred_element_type=jnp.float32)           # (tile_n, 128)

        @pl.when(t == 0)
        def _():
            s2_ref[...] = jnp.zeros_like(s2_ref)

        def accum(h):
            s2_ref[0] += jnp.concatenate(
                [jnp.sum(h, axis=0, keepdims=True),
                 jnp.sum(h * h, axis=0, keepdims=True)], axis=0)

        if needs_mask:
            last = pl.num_programs(1) - 1

            @pl.when(t != last)                     # common path: no mask work
            def _():
                accum(h2)

            @pl.when(t == last)                     # only the last tile pays
            def _():
                accum(jnp.where(_row_mask(t, tile_n, n_valid), h2, 0.0))
        else:
            accum(h2)

    return kernel


def _make_bn3_pool_kernel(n_valid, tile_n, n_pad):
    """Recompute layers 1-2, run conv3; accumulate BN3 [sum, sumsq] plus the
    per-batch running max AND min of the *pre-BN* conv3 output (BN3 + max-pool
    are fused in the epilogue via sign(scale) selection)."""
    needs_mask = n_pad != n_valid

    def kernel(x_ref, w1_ref, sh1_ref, w2_ref, sc2_ref, sh2_ref, w3_ref,
               s3_ref, mx_ref, mn_ref):
        t = pl.program_id(1)
        xt = x_ref[0]                                              # (8, tile_n)
        # layer 1 (recomputed, <1% of FLOPs; BN1 scale folded into w1)
        h1 = lax.dot_general(xt, w1_ref[...], _CONTRACT_C,
                             preferred_element_type=jnp.float32)
        h1 = jnp.maximum(h1 + sh1_ref[...], 0.0)
        # layer 2 (recomputed, ~6% of FLOPs)
        h2 = jnp.dot(h1.astype(w2_ref.dtype), w2_ref[...],
                     preferred_element_type=jnp.float32)
        h2 = jnp.maximum(h2 * sc2_ref[...] + sh2_ref[...], 0.0)
        # layer 3: the dominant 128 -> 1024 matmul, never normalized in-kernel
        h3 = jnp.dot(h2.astype(w3_ref.dtype), w3_ref[...],
                     preferred_element_type=jnp.float32)           # (tile_n, 1024)

        @pl.when(t == 0)
        def _():
            s3_ref[...] = jnp.zeros_like(s3_ref)
            mx_ref[...] = jnp.full(mx_ref.shape, -jnp.inf, mx_ref.dtype)
            mn_ref[...] = jnp.full(mn_ref.shape, jnp.inf, mn_ref.dtype)

        def accum_unmasked(h):
            s3_ref[0] += jnp.concatenate(
                [jnp.sum(h, axis=0, keepdims=True),
                 jnp.sum(h * h, axis=0, keepdims=True)], axis=0)
            mx_ref[0] = jnp.maximum(mx_ref[0],
                                    jnp.max(h, axis=0, keepdims=True))
            mn_ref[0] = jnp.minimum(mn_ref[0],
                                    jnp.min(h, axis=0, keepdims=True))

        if needs_mask:
            last = pl.num_programs(1) - 1

            @pl.when(t != last)                     # common path: no mask work
            def _():
                accum_unmasked(h3)

            @pl.when(t == last)                     # only the last tile pays
            def _():
                m = _row_mask(t, tile_n, n_valid)
                hs = jnp.where(m, h3, 0.0)
                s3_ref[0] += jnp.concatenate(
                    [jnp.sum(hs, axis=0, keepdims=True),
                     jnp.sum(hs * hs, axis=0, keepdims=True)], axis=0)
                mx_ref[0] = jnp.maximum(
                    mx_ref[0],
                    jnp.max(jnp.where(m, h3, -jnp.inf), axis=0, keepdims=True))
                mn_ref[0] = jnp.minimum(
                    mn_ref[0],
                    jnp.min(jnp.where(m, h3, jnp.inf), axis=0, keepdims=True))
        else:
            accum_unmasked(h3)

    return kernel


# ---------------------------------------------------------------------------
# Wrapper
# ---------------------------------------------------------------------------
def _bn_affine(stats, gamma, beta, count):
    """stats: (B, 2, C) per-batch partial [sum, sum_sq]  ->  (scale, shift)."""
    s = jnp.sum(stats[:, 0, :], axis=0)
    ss = jnp.sum(stats[:, 1, :], axis=0)
    mean = s / count
    # NOTE: single-pass E[x^2]-E[x]^2 in f32; clamped >= 0 (see review concern).
    var = jnp.maximum(ss / count - mean * mean, 0.0)
    scale = gamma * lax.rsqrt(var + EPS)                 # (1, C)
    shift = beta - mean * scale                          # (1, C)
    return scale, shift


def pointnetfeat_forward(x_ncl, params, *, compute_dtype=jnp.bfloat16,
                         tile_n=None):
    """x_ncl: (B, 3, N) float32 (PyTorch NCL layout).  Returns (B, 1024)."""
    B, c_in, N = x_ncl.shape
    assert c_in == 3
    (w1, b1, g1, be1, w2, b2, g2, be2, w3, b3, g3, be3) = params
    del b1, b2, b3   # conv biases cancel exactly inside training-mode BatchNorm

    tile_n, n_pad, vmem_limit = _select_tiling(N, tile_n)
    num_tiles = n_pad // tile_n
    count = jnp.float32(B * N)

    x = x_ncl.astype(jnp.float32)
    # native (B, C, N) layout: pad channels 3->8 (sublanes) and points to tile.
    xp = jnp.pad(x, ((0, 0), (0, _CIN_PAD - 3), (0, n_pad - N)))   # (B, 8, Np)

    # ---- BN1 statistics in closed form (linear moments of x, no kernel) -----
    s1 = jnp.sum(x, axis=(0, 2))                          # (3,)
    s2 = jnp.einsum('bcn,bdn->cd', x, x)                  # (3, 3)
    mean_h1 = (s1 / count) @ w1                           # (64,)
    e2_h1 = jnp.einsum('ic,ij,jc->c', w1, s2 / count, w1)  # diag(w1^T E[xx^T] w1)
    var_h1 = jnp.maximum(e2_h1 - mean_h1 * mean_h1, 0.0)
    sc1 = g1 * lax.rsqrt(var_h1 + EPS)                    # (1, 64)
    sh1 = be1 - mean_h1 * sc1                             # (1, 64)

    # BN1 affine scale folded into the (zero-padded) conv1 weight.
    w1_eff = jnp.pad(w1, ((0, _CIN_PAD - 3), (0, 0))) * sc1        # (8, 64) f32
    w2c = w2.astype(compute_dtype)                                 # (64, 128)
    w3c = w3.astype(compute_dtype)                                 # (128, 1024)

    grid = (B, num_tiles)
    cparams = pltpu.CompilerParams(
        dimension_semantics=("parallel", "arbitrary"),
        vmem_limit_bytes=vmem_limit)

    x_spec = pl.BlockSpec((1, _CIN_PAD, tile_n), lambda b, t: (b, 0, t))

    def const_spec(a):          # parameters: resident, never re-fetched
        return pl.BlockSpec(a.shape, lambda b, t: (0,) * a.ndim)

    def stats_spec(c):          # per-batch accumulator, revisited over t
        return pl.BlockSpec((1, 2, c), lambda b, t: (b, 0, 0))

    pool_spec = pl.BlockSpec((1, 1, _C3), lambda b, t: (b, 0, 0))

    # ---- phase A: BN2 stats (conv1 recomputed, cheap) ------------------------
    s2st = pl.pallas_call(
        _make_bn2_stats_kernel(N, tile_n, n_pad),
        out_shape=jax.ShapeDtypeStruct((B, 2, _C2), jnp.float32),
        grid=grid,
        in_specs=[x_spec, const_spec(w1_eff), const_spec(sh1), const_spec(w2c)],
        out_specs=stats_spec(_C2),
        compiler_params=cparams,
    )(xp, w1_eff, sh1, w2c)
    sc2, sh2 = _bn_affine(s2st, g2, be2, count)

    # ---- phase B: conv3 + BN3 stats + fused max/min pooling ------------------
    flops = 2 * B * n_pad * (_CIN_PAD * _C1 + _C1 * _C2 + _C2 * _C3)
    bytes_accessed = int(xp.size * 4
                         + w2c.size * w2c.dtype.itemsize
                         + w3c.size * w3c.dtype.itemsize
                         + B * _C3 * 4 * 4)
    s3st, mx, mn = pl.pallas_call(
        _make_bn3_pool_kernel(N, tile_n, n_pad),
        out_shape=(jax.ShapeDtypeStruct((B, 2, _C3), jnp.float32),
                   jax.ShapeDtypeStruct((B, 1, _C3), jnp.float32),
                   jax.ShapeDtypeStruct((B, 1, _C3), jnp.float32)),
        grid=grid,
        in_specs=[x_spec, const_spec(w1_eff), const_spec(sh1), const_spec(w2c),
                  const_spec(sc2), const_spec(sh2), const_spec(w3c)],
        out_specs=(stats_spec(_C3), pool_spec, pool_spec),
        compiler_params=cparams,
        cost_estimate=pl.CostEstimate(flops=flops, transcendentals=0,
                                      bytes_accessed=bytes_accessed),
    )(xp, w1_eff, sh1, w2c, sc2, sh2, w3c)

    # ---- tiny epilogue (plain JAX on (B,1024)): BN3 affine fused with max ----
    # max over N commutes with the per-channel affine up to sign(scale):
    #   scale >= 0 -> use running max ; scale < 0 -> use running min.
    sc3, sh3 = _bn_affine(s3st, g3, be3, count)
    mx = mx[:, 0, :]
    mn = mn[:, 0, :]
    return jnp.where(sc3 >= 0.0, mx * sc3, mn * sc3) + sh3


# ---------------------------------------------------------------------------
# Parameters & reference
# ---------------------------------------------------------------------------
def init_params(key):
    """Synthetic parameters matching PointNetfeat.__init__ shapes.
    Conv1d weights stored as (C_in, C_out) (= PyTorch weight[:, :, 0].T);
    biases / BN gamma / BN beta stored as (1, C_out)."""
    keys = jax.random.split(key, 12)
    dims = [(3, _C1), (_C1, _C2), (_C2, _C3)]
    params = []
    for li, (cin, cout) in enumerate(dims):
        kw, kb, kg, kbe = keys[4 * li: 4 * li + 4]
        scale = 1.0 / jnp.sqrt(jnp.float32(cin))
        w = jax.random.uniform(kw, (cin, cout), jnp.float32, -scale, scale)
        b = jax.random.uniform(kb, (1, cout), jnp.float32, -scale, scale)
        gamma = jax.random.uniform(kg, (1, cout), jnp.float32, 0.5, 1.5)
        beta = 0.1 * jax.random.normal(kbe, (1, cout), jnp.float32)
        params += [w, b, gamma, beta]
    return tuple(params)


def _bn_train_ref(h, gamma, beta):
    mean = jnp.mean(h, axis=(0, 1), keepdims=True)
    var = jnp.mean((h - mean) ** 2, axis=(0, 1), keepdims=True)
    return (h - mean) * (gamma * lax.rsqrt(var + EPS)) + beta


def reference_forward(x_ncl, params):
    """Pure-JAX reference (training-mode BN, biased variance, eps=1e-5),
    including the conv biases (which mathematically cancel inside BN)."""
    (w1, b1, g1, be1, w2, b2, g2, be2, w3, b3, g3, be3) = params
    h = jnp.transpose(x_ncl, (0, 2, 1))
    h = jnp.maximum(_bn_train_ref(h @ w1 + b1, g1, be1), 0.0)
    h = jnp.maximum(_bn_train_ref(h @ w2 + b2, g2, be2), 0.0)
    h = _bn_train_ref(h @ w3 + b3, g3, be3)
    return jnp.max(h, axis=1)


if __name__ == "__main__":
    key = jax.random.PRNGKey(0)
    k_x, k_p, k_x2 = jax.random.split(key, 3)

    B, N = 2, 16
    x = jax.random.normal(k_x, (B, 3, N), jnp.float32)     # PyTorch (B, 3, N)
    params = init_params(k_p)
    ref = jax.block_until_ready(reference_forward(x, params))

    # Default path: bf16 MXU matmuls for conv2/conv3, f32 accumulation/stats.
    out = jax.block_until_ready(pointnetfeat_forward(x, params))
    assert out.shape == (B, _C3), out.shape
    assert bool(jnp.all(jnp.isfinite(out)))
    assert jnp.allclose(out, ref, atol=1e-1, rtol=1e-1), (
        float(jnp.max(jnp.abs(out - ref))))

    # f32 path: strict check against the pure-JAX reference.
    out32 = jax.block_until_ready(
        pointnetfeat_forward(x, params, compute_dtype=jnp.float32))
    assert jnp.allclose(out32, ref, atol=2e-3, rtol=2e-3), (
        float(jnp.max(jnp.abs(out32 - ref))))

    # Multi-tile + masked-last-tile path (forced small tile_n), f32, strict.
    N2 = 300
    x2 = jax.random.normal(k_x2, (B, 3, N2), jnp.float32)
    ref2 = jax.block_until_ready(reference_forward(x2, params))
    out2 = jax.block_until_ready(
        pointnetfeat_forward(x2, params, compute_dtype=jnp.float32, tile_n=128))
    assert jnp.allclose(out2, ref2, atol=2e-3, rtol=2e-3), (
        float(jnp.max(jnp.abs(out2 - ref2))))

    print("KERNEL_OK")
</pallas_src>

<mosaic_0001>
module attributes {stable_mosaic.version = 11 : i64} {
  func.func @kernel(%arg0: i32, %arg1: i32, %arg2: memref<1x8x16xf32, #tpu.memory_space<vmem>>, %arg3: memref<8x64xf32, #tpu.memory_space<vmem>>, %arg4: memref<1x64xf32, #tpu.memory_space<vmem>>, %arg5: memref<64x128xbf16, #tpu.memory_space<vmem>>, %arg6: memref<1x2x128xf32, #tpu.memory_space<vmem>>) attributes {dimension_semantics = [#tpu.dimension_semantics<parallel>, #tpu.dimension_semantics<arbitrary>], iteration_bounds = array<i64: 2, 1>, scalar_prefetch = 0 : i64, scratch_operands = 0 : i64, tpu.core_type = #tpu.core_type<tc>, window_params = [{transform_indices = @transform_0, window_bounds = array<i64: 1, 8, 16>}, {pipeline_mode = #tpu.pipeline_mode<synchronous>, transform_indices = @transform_1, window_bounds = array<i64: 8, 64>}, {pipeline_mode = #tpu.pipeline_mode<synchronous>, transform_indices = @transform_2, window_bounds = array<i64: 1, 64>}, {pipeline_mode = #tpu.pipeline_mode<synchronous>, transform_indices = @transform_3, window_bounds = array<i64: 64, 128>}, {transform_indices = @transform_4, window_bounds = array<i64: 1, 2, 128>}]} {
    %c0 = arith.constant 0 : index
    %c0_0 = arith.constant 0 : index
    %c0_1 = arith.constant 0 : index
    %0 = vector.load %arg2[%c0, %c0_0, %c0_1] : memref<1x8x16xf32, #tpu.memory_space<vmem>>, vector<1x8x16xf32>
    %1 = vector.shape_cast %0 : vector<1x8x16xf32> to vector<8x16xf32>
    %c0_2 = arith.constant 0 : index
    %c0_3 = arith.constant 0 : index
    %2 = vector.load %arg3[%c0_2, %c0_3] : memref<8x64xf32, #tpu.memory_space<vmem>>, vector<8x64xf32>
    %cst = arith.constant dense<0.000000e+00> : vector<16x64xf32>
    %3 = tpu.matmul %1, %2, %cst {dimension_numbers = #tpu.dot_dimension_numbers<[0], [0], [1], [1], [0, 1, 1, 1], [], []>} : vector<8x16xf32>, vector<8x64xf32>, vector<16x64xf32> -> vector<16x64xf32>
    %c0_4 = arith.constant 0 : index
    %c0_5 = arith.constant 0 : index
    %4 = vector.load %arg4[%c0_4, %c0_5] : memref<1x64xf32, #tpu.memory_space<vmem>>, vector<1x64xf32>
    %5 = vector.broadcast %4 : vector<1x64xf32> to vector<16x64xf32>
    %6 = arith.addf %3, %5 : vector<16x64xf32>
    %cst_6 = arith.constant 0.000000e+00 : f32
    %7 = vector.broadcast %cst_6 : f32 to vector<16x64xf32>
    %8 = arith.maximumf %6, %7 : vector<16x64xf32>
    %9 = arith.truncf %8 : vector<16x64xf32> to vector<16x64xbf16>
    %c0_7 = arith.constant 0 : index
    %c0_8 = arith.constant 0 : index
    %10 = vector.load %arg5[%c0_7, %c0_8] : memref<64x128xbf16, #tpu.memory_space<vmem>>, vector<64x128xbf16>
    %cst_9 = arith.constant dense<0.000000e+00> : vector<16x128xf32>
    %11 = tpu.matmul %9, %10, %cst_9 {dimension_numbers = #tpu.dot_dimension_numbers<[1], [0], [0], [1], [0, 0, 1, 1], [], []>} : vector<16x64xbf16>, vector<64x128xbf16>, vector<16x128xf32> -> vector<16x128xf32>
    %c0_i32 = arith.constant 0 : i32
    %12 = arith.cmpi eq, %arg1, %c0_i32 : i32
    %13 = arith.extui %12 : i1 to i32
    %c0_i32_10 = arith.constant 0 : i32
    %14 = arith.cmpi ne, %13, %c0_i32_10 : i32
    scf.if %14 {
      %cst_19 = arith.constant 0.000000e+00 : f32
      %27 = vector.broadcast %cst_19 : f32 to vector<1x2x128xf32>
      %c0_20 = arith.constant 0 : index
      %c0_21 = arith.constant 0 : index
      %c0_22 = arith.constant 0 : index
      %28 = vector.load %arg6[%c0_20, %c0_21, %c0_22] : memref<1x2x128xf32, #tpu.memory_space<vmem>>, vector<1x2x128xf32>
      tpu.vector_store %arg6[%c0_20, %c0_21, %c0_22], %27 {strides = array<i32>} : memref<1x2x128xf32, #tpu.memory_space<vmem>>, vector<1x2x128xf32>,
    } else {
    }
    %c0_11 = arith.constant 0 : index
    %c0_12 = arith.constant 0 : index
    %c0_13 = arith.constant 0 : index
    %15 = vector.load %arg6[%c0_11, %c0_12, %c0_13] : memref<1x2x128xf32, #tpu.memory_space<vmem>>, vector<1x2x128xf32>
    %16 = vector.shape_cast %15 : vector<1x2x128xf32> to vector<2x128xf32>
    %cst_14 = arith.constant dense<0.000000e+00> : vector<128xf32>
    %17 = vector.multi_reduction <add>, %11, %cst_14 [0] : vector<16x128xf32> to vector<128xf32>
    %18 = vector.shape_cast %17 : vector<128xf32> to vector<1x128xf32>
    %19 = arith.mulf %11, %11 : vector<16x128xf32>
    %cst_15 = arith.constant dense<0.000000e+00> : vector<128xf32>
    %20 = vector.multi_reduction <add>, %19, %cst_15 [0] : vector<16x128xf32> to vector<128xf32>
    %21 = vector.shape_cast %20 : vector<128xf32> to vector<1x128xf32>
    %22 = tpu.concatenate %18, %21 in 0 : vector<1x128xf32>, vector<1x128xf32> -> vector<2x128xf32>
    %23 = arith.addf %16, %22 : vector<2x128xf32>
    %c0_16 = arith.constant 0 : index
    %c0_17 = arith.constant 0 : index
    %c0_18 = arith.constant 0 : index
    %24 = vector.load %arg6[%c0_16, %c0_17, %c0_18] : memref<1x2x128xf32, #tpu.memory_space<vmem>>, vector<1x2x128xf32>
    %25 = vector.shape_cast %24 : vector<1x2x128xf32> to vector<2x128xf32>
    %26 = vector.shape_cast %23 : vector<2x128xf32> to vector<1x2x128xf32>
    tpu.vector_store %arg6[%c0_16, %c0_17, %c0_18], %26 {strides = array<i32>} : memref<1x2x128xf32, #tpu.memory_space<vmem>>, vector<1x2x128xf32>,
    return
  }
  func.func @transform_0(%arg0: i32, %arg1: i32) -> (i32, i32, i32) {
    %c0_i32 = arith.constant 0 : i32
    %c0_i32_0 = arith.constant 0 : i32
    return %arg0, %c0_i32, %arg1 : i32, i32, i32
  }
  func.func @transform_1(%arg0: i32, %arg1: i32) -> (i32, i32) {
    %c0_i32 = arith.constant 0 : i32
    %c0_i32_0 = arith.constant 0 : i32
    %c0_i32_1 = arith.constant 0 : i32
    return %c0_i32, %c0_i32_0 : i32, i32
  }
  func.func @transform_2(%arg0: i32, %arg1: i32) -> (i32, i32) {
    %c0_i32 = arith.constant 0 : i32
    %c0_i32_0 = arith.constant 0 : i32
    %c0_i32_1 = arith.constant 0 : i32
    return %c0_i32, %c0_i32_0 : i32, i32
  }
  func.func @transform_3(%arg0: i32, %arg1: i32) -> (i32, i32) {
    %c0_i32 = arith.constant 0 : i32
    %c0_i32_0 = arith.constant 0 : i32
    %c0_i32_1 = arith.constant 0 : i32
    return %c0_i32, %c0_i32_0 : i32, i32
  }
  func.func @transform_4(%arg0: i32, %arg1: i32) -> (i32, i32, i32) {
    %c0_i32 = arith.constant 0 : i32
    %c0_i32_0 = arith.constant 0 : i32
    %c0_i32_1 = arith.constant 0 : i32
    return %arg0, %c0_i32, %c0_i32_0 : i32, i32, i32
  }
}

</mosaic_0001>

<bundles_post_ra>
// kernel: tpu_custom_call.1
= control target key start
LH: loop header
LB: loop body
LE: loop exit
PB: predicated region body
PF: predicated region fallthrough
CT: control target
= control target key end

     0   :  { %9 = vsyncpa [#allocation3], 0  ;;  %s1198_s0 = inlined_call_operand.hbm [shape: f32[2,8,16], index: 0, kind: input, shape index: {}]   ;;  %s1199_s1 = inlined_call_operand.hbm [shape: f32[8,64], index: 1, kind: input, shape index: {}]   ;;  %s1200_s2 = inlined_call_operand.vmem [shape: f32[1,64], index: 2, kind: input, shape index: {}]   ;;  %s1201_s3 = inlined_call_operand.hbm [shape: bf16[64,128], index: 3, kind: input, shape index: {}]   ;;  %s1202_s4 = inlined_call_operand.hbm [shape: f32[2,2,128], index: 4, kind: output, shape index: {}]  }
   0x1   :  { %11 = vsyncpa [#allocation3 + $0x1], 0 }
   0x2   :  { %12 = vsyncpa [#allocation6], 0 }
   0x3   :  { %13 = vsyncpa [#allocation4], 0 }
   0x4   :  { %15 = vsyncpa [#allocation4 + $0x1], 0  ;;  %s945_s15 = smov 0   ;;  %s947_s16 = smov 0  }
   0x5   :  { %s949_s17 = smov 0   ;;  %s951_s18 = smov 0  }
   0x6   :  { %s953_s19 = smov 0   ;;  %s955_s20 = smov 0  }
   0x7 LB: > { %s597_s21 = sadd.s32 4294967295, %s910_s20   ;;  %s598_s22 = sadd.s32 4294967294, %s910_s20   ;;  %s910_s20 = sphi %s955_s20, %s21_s20   ;;  %s906_s19 = sphi %s953_s19, %s1225_s19   ;;  %s902_s18 = sphi %s951_s18, %s1224_s18   ;;  %s898_s17 = sphi %s949_s17, %s1223_s17   ;;  %s894_s16 = sphi %s947_s16, %s1222_s16   ;;  %s890_s15 = sphi %s945_s15, %s1221_s15  }
   0x8   : > { %p55_p0 = scmp.ne.s32.totalorder %s894_s16, %s890_s15  ;;  %p979_p1 = scmp.eq.s32.totalorder %s597_s21, 0 }
   0x9   : > { %p983_p2 = scmp.eq.s32.totalorder %s597_s21, 1  ;;  %p148_p3 = scmp.eq.s32.totalorder %s598_s22, 1 }
   0xa   : > { %s1207_s23 = scalar_select %p979_p1, 1, 0 }
   0xb   : > { %s1208_s24 = scalar_select %p983_p2, 1, 0 }
   0xc   : > { %p989_p4 = por %p979_p1, %p55_p0  ;;  %p599_p5 = scmp.ge.s32.totalorder %s910_s20, 1 }
   0xd   : > { %p994_p6 = por %p148_p3, %p55_p0  ;;  %p155_p7 = scmp.lt.s32.totalorder %s910_s20, 3 }
   0xe   : > { %s1209_s25 = scalar_select %p989_p4, 1, 0 }
   0xf   : > { %s1210_s26 = scalar_select %p994_p6, 1, 0 }
  0x10   : > { %p999_p8 = pnand %p599_p5, %p155_p7  ;;  %s912_s28 = smov [#allocation5]  }
  0x11   : > { %s168_s29 = sshll.u32 %s912_s28, 4  ;;  %s913_s30 = smov [#allocation7]   ;;  %s169_s29 = int_to_ptr.vmem [resolvable:$true] %s168_s29 }
  0x12   : > { %s1211_s27 = scalar_select %p999_p8, 1, 0 }
  0x13   : > { %p659_p10 = pneg %p999_p8  ;;  %s181_s5 = sshll.u32 %s913_s30, 4  ;;  %s1012_s5 = int_to_ptr.vmem [resolvable:$true] %s181_s5 }
  0x14   : > { %s738_s9 = scalar_lea.hbm %s1199_s1, 128 }
  0x15   : > { %p1008_p11 = pnand %p659_p10, %p979_p1  ;;  %p739_p12 = scmp.ne.s32.totalorder %s1199_s1, %s738_s9 }
  0x16   : > { %p745_p5 = scmp.lt.u32.totalorder %s738_s9, %s1199_s1 }
  0x17   : > { %p740_p13 = pneg %p1008_p11 }
  0x19   : > { %p741_p0 = pnand %p740_p13, %p739_p12 }
  0x1b   : > { %p742_p3 = pneg %p741_p0 }
  0x1d   : > { %p747_p7 = pnand %p745_p5, %p742_p3 }
  0x1f   : > { %750 = shalt.err (!%p747_p7)
}
  0x20   : > { %s751_s14 = scalar_lea.vmem %s169_s29, 128  ;;  %p759_p1 = scmp.lt.s32.totalorder %s169_s29, %s169_s29 }
  0x21   : > { %p752_p10 = scmp.ne.s32.totalorder %s169_s29, %s751_s14  ;;  %p760_p4 = scmp.lt.s32.totalorder %s751_s14, %s751_s14 }
  0x23   : > { %p754_p9 = pnand %p752_p10, %p740_p13  ;;  %p761_p8 = por %p760_p4, %p759_p1 }
  0x25   : > { %p755_p6 = pneg %p754_p9 }
  0x27   : > { %p762_p2 = pnand %p761_p8, %p755_p6 }
  0x29   : > { %765 = shalt.err (!%p762_p2)
}
  0x2a   : > { %662 = dma.hbm_to_vmem [thread:$0]  (!%p1008_p11), %s1199_s1, 128, %s169_s29, [#allocation6]  }
  0x2b   : > { %s766_s7 = scalar_lea.hbm %s1201_s3, 512 }
  0x2c   : > { %p767_p9 = scmp.ne.s32.totalorder %s1201_s3, %s766_s7  ;;  %p773_p2 = scmp.lt.u32.totalorder %s766_s7, %s1201_s3 }
  0x2e   : > { %p769_p1 = pnand %p767_p9, %p740_p13 }
  0x30   : > { %p770_p4 = pneg %p769_p1 }
  0x32   : > { %p775_p6 = pnand %p773_p2, %p770_p4 }
  0x34   : > { %778 = shalt.err (!%p775_p6)
}
  0x35   : > { %s779_s29 = scalar_lea.vmem %s1012_s5, 512  ;;  %p787_p3 = scmp.lt.s32.totalorder %s1012_s5, %s1012_s5 }
  0x36   : > { %p780_p8 = scmp.ne.s32.totalorder %s1012_s5, %s779_s29  ;;  %p788_p5 = scmp.lt.s32.totalorder %s779_s29, %s779_s29 }
  0x38   : > { %p782_p12 = pnand %p780_p8, %p740_p13  ;;  %p789_p7 = por %p788_p5, %p787_p3 }
  0x3a   : > { %p783_p0 = pneg %p782_p12 }
  0x3c   : > { %p790_p10 = pnand %p789_p7, %p783_p0 }
  0x3e   : > { %793 = shalt.err (!%p790_p10)
}
  0x3f   : > { %s914_s12 = smov 64   ;;  %s915_s13 = smov 4  }
  0x40   : > { %665 = dma.hbm_to_vmem [thread:$0]  (!%p1008_p11), %s1201_s3, 512, %s1012_s5, [#allocation6], %s914_s12, %s914_s12, %s915_s13  }
  0x41   : > { %s33_s22 = sadd.s32 1, %s906_s19  ;;  %s42_s28 = sadd.s32 1, %s898_s17 }
  0x42   : > { %p35_p13 = scmp.ge.s32.totalorder %s33_s22, 2  ;;  %p49_p9 = scmp.ne.s32.totalorder %s898_s17, %s894_s16 }
  0x43   : > { %p50_p1 = scmp.eq.s32.totalorder %s910_s20, 0  ;;  %p676_p4 = scmp.lt.s32.totalorder %s910_s20, 2 }
  0x44   : > { %s1227_s22 = smov (%p35_p13, %s33_s22), 0  ;;  %p1213_p6 = scmp.ne.s32.totalorder %s1208_s24, 0 }
  0x45   : > { %p51_p2 = por %p50_p1, %p49_p9  ;;  %s37_s6 = ssub.s32 %s906_s19, %s1227_s22 }
  0x46   : > { %p1071_p8 = por %p1213_p6, %p49_p9  ;;  %s195_s7 = sand.u32 1, %s898_s17  }
  0x47   : > { %p40_p12 = scmp.eq.s32.totalorder %s37_s6, 0  ;;  %s603_s5 = sshll.u32 %s195_s7, 3 }
  0x48   : > { %s604_s8 = sshll.u32 %s906_s19, 7  ;;  %s199_s24 = scalar_lea.vmem [#allocation2], %s603_s5 }
  0x49   : > { %s1080_s9 = scalar_select %p40_p12, %s898_s17, %s42_s28  }
  0x4a   : > { %s1085_s29 = scalar_lea.hbm %s1198_s0, %s604_s8  ;;  %s207_s12 = sshll.u32 %s199_s24, 4  ;;  %s1093_s12 = int_to_ptr.vmem [resolvable:$true] %s207_s12 }
  0x4b   : > { %p1089_p11 = pnand %p676_p4, %p51_p2  ;;  %s196_s14 = scalar_lea.sflag [#allocation3], %s195_s7 }
  0x4c   : > { %s794_s21 = scalar_lea.hbm %s1085_s29, 128  ;;  %s799_s5 = scalar_lea.hbm %s1198_s0, 256 }
  0x4d   : > { %p795_p0 = scmp.ne.s32.totalorder %s1085_s29, %s794_s21  ;;  %p796_p3 = pneg %p1089_p11 }
  0x4e   : > { %p800_p10 = scmp.lt.u32.totalorder %s1085_s29, %s1198_s0  ;;  %p801_p13 = scmp.lt.u32.totalorder %s799_s5, %s794_s21 }
  0x4f   : > { %p797_p5 = pnand %p796_p3, %p795_p0  ;;  %p803_p1 = scmp.lt.u32.totalorder %s794_s21, %s1085_s29 }
  0x50   : > { %p802_p9 = por %p801_p13, %p800_p10 }
  0x51   : > { %p798_p7 = pneg %p797_p5 }
  0x52   : > { %p804_p4 = por %p803_p1, %p802_p9 }
  0x54   : > { %p805_p2 = pnand %p804_p4, %p798_p7 }
  0x56   : > { %808 = shalt.err (!%p805_p2)
}
  0x57   : > { %s809_s7 = scalar_lea.vmem %s1093_s12, 128  ;;  %s916_s11 = smov [#allocation2]  }
  0x58   : > { %p810_p6 = scmp.ne.s32.totalorder %s1093_s12, %s809_s7  ;;  %s814_s24 = sshll.u32 %s916_s11, 4  ;;  %s815_s24 = int_to_ptr.vmem [resolvable:$false] %s814_s24 }
  0x59   : > { %s816_s28 = scalar_lea.vmem %s815_s24, 256  ;;  %p817_p5 = scmp.lt.s32.totalorder %s1093_s12, %s815_s24 }
  0x5a   : > { %p812_p12 = pnand %p810_p6, %p796_p3  ;;  %p818_p10 = scmp.lt.s32.totalorder %s816_s28, %s809_s7 }
  0x5c   : > { %p813_p0 = pneg %p812_p12  ;;  %p819_p13 = por %p818_p10, %p817_p5 }
  0x5e   : > { %p820_p9 = pnand %p819_p13, %p813_p0 }
  0x60   : > { %823 = shalt.err (!%p820_p9)
}
  0x61   : > { %669 = dma.hbm_to_vmem [thread:$0]  (!%p1089_p11), %s1085_s29, 128, %s1093_s12, %s196_s14  }
  0x62   : > { %p1216_p7 = scmp.ne.s32.totalorder %s1211_s27, 0 }
  0x63   : > { %s1123_s21 = sand.u32 (!%p1216_p7), 1, %s894_s16   ;;  %p1217_p3 = scmp.ne.s32.totalorder (!%p1216_p7), %s1209_s25, 0 }
  0x64   : > { %216 = sbr.rel (%p1216_p7) target bundleno = 711 (0x2c7), region = 36  ;;  %s606_s6 = sshll.u32 (!%p1216_p7), %s1123_s21, 3 }
  0x65   : > { %s219_s5 = scalar_lea.sflag (!%p1216_p7), [#allocation3], %s1123_s21  ;;  %s222_s8 = scalar_lea.vmem (!%p1216_p7), [#allocation2], %s606_s6 }
  0x6b   : > { %877 = dma.done.wait (%p1217_p3), %s219_s5, 128  }
  0x6c   : > { %879 = vsyncadd (%p1217_p3), %s219_s5, 4294967168  ;;  %p1218_p1 = scmp.ne.s32.totalorder %s1207_s23, 0 }
  0x6e   : > { %881 = dma.done.wait (%p1218_p1), [#allocation6], 640  }
  0x6f   : > { %883 = vsyncadd (%p1218_p1), [#allocation6], 4294966656  ;;  %v256_v0 = vld [vmem:[%s222_s8] sm:$0xff]  ;;  %v257_v1 = vld [vmem:[#allocation5] sm:$0xff]  ;;  %v917_v3 = vmov 0.0   ;;  %vm297_vm0 = vcmask 64512  }
  0x70   : > { %265 = vxpose.xlu0.b32.start.end [1/1] (short) (narrow) %v256_v0, 16  ;;  %630 = vmatprep.subr.mxu0 %v257_v1  ;;  %v734_v2 = vld [vmem:[#allocation7] sm:$0xff]   ;;  %v735_v4 = vld [vmem:[#allocation7 + $0x8] sm:$0xff]   ;;  %v736_v7 = vld [vmem:[#allocation7 + $0x10] sm:$0xff]   ;;  %vm918_vm1 = vmmov 0   ;;  %vm414_vm2 = vcmask 523264  }
  0x71   : > { %631 = vmatpush3.msra.mxu0 %v257_v1  ;;  %635 = vmatprep.subr.bf16.mxu1 %v917_v3  ;;  %v737_v8 = vld [vmem:[#allocation7 + $0x18] sm:$0xff]   ;;  %v610_v9 = vld [vmem:[%s1200_s2] ss:$0 sm:$0xff]  ;;  %s609_s27 = sshll.u32 %s1123_s21, 1  ;;  %vm481_vm3 = vcmask 1040384   ;;  %s619_s12 = sshll.u32 %s902_s18, 5 }
  0x72   : > { %636 = vmatpush3.bf16.msra.mxu1 %v734_v2  ;;  %643 = vmatprep.mubr.msk.bf16.mxu1 %vm918_vm1, %v917_v3  ;;  %s1139_s29 = scalar_lea.vmem [#allocation8], %s609_s27  ;;  %s1148_s7 = scalar_lea.hbm %s1202_s4, %s619_s12 }
  0x73   : > { %637 = vmatprep.subr.bf16.mxu1 %v917_v3  ;;  %463 = vst [vmem:[%s1139_s29] sm:$0x3] %v917_v3  ;;  %s499_s13 = sshll.u32 %s1139_s29, 4  ;;  %s486_s11 = scalar_lea.sflag [#allocation4], %s1123_s21  ;;  %s1150_s13 = int_to_ptr.vmem [resolvable:$true] %s499_s13 }
  0x74   : > { %s824_s24 = scalar_lea.vmem %s1150_s13, 32  ;;  %s919_s18 = smov [#allocation8]  }
  0x75   : > { %p825_p11 = scmp.ne.s32.totalorder %s1150_s13, %s824_s24  ;;  %s828_s28 = sshll.u32 %s919_s18, 4  ;;  %s829_s28 = int_to_ptr.vmem [resolvable:$false] %s828_s28 }
  0x76   : > { %638 = vmatpush3.bf16.msra.mxu1 %v735_v4  ;;  %s830_s6 = scalar_lea.vmem %s829_s28, 64  ;;  %p831_p6 = scmp.lt.s32.totalorder %s1150_s13, %s829_s28 }
  0x77   : > { %639 = vmatprep.subr.bf16.mxu1 %v917_v3  ;;  %p826_p4 = pnand %p825_p11, %p1071_p8  ;;  %p832_p12 = scmp.lt.s32.totalorder %s830_s6, %s824_s24 }
  0x79   : > { %p827_p2 = pneg %p826_p4  ;;  %p833_p0 = por %p832_p12, %p831_p6 }
  0x7a   : > { %640 = vmatpush3.bf16.msra.mxu1 %v736_v7  ;;  %v464_v37 = vld [vmem:[%s1139_s29] sm:$0x3] }
  0x7b   : > { %641 = vmatprep.subr.bf16.mxu1 %v917_v3  ;;  %p834_p5 = pnand %p833_p0, %p827_p2 }
  0x7e   : > { %642 = vmatpush3.bf16.msra.mxu1 %v737_v8 }
  0xf0   : > { %v281_v5 = vpop.trf.xlu0 }
  0xf1   : > { %632 = vmatprep.mubr.msk.f32.mxu0 %vm297_vm0, %v281_v5 }
  0xf4   : > { %v282_v6 = vpop.trf.xlu0 }
  0xf5   : > { %633 = vmatmul.mubr.msk.f32.vlgmr.msra.gmra.mrb[0].mxu0 %vm297_vm0, %v282_v6 }
 0x1c8   : > { %v634_v10 = vpop.f32.mrb[0].mxu0 }
 0x1c9   : > { %v376_v11 = vadd.f32 %v634_v10, %v610_v9  ;;  %v370_v12 = vpop.f32.mrb[1].mxu0 }
 0x1ca   : > { %v371_v13 = vadd.f32 %v610_v9, %v370_v12 }
 0x1cb   : > { %v380_v14 = vmax.f32 %v376_v11, 0.0 }
 0x1cc   : > { %v379_v15 = vmax.f32 %v371_v13, 0.0 }
 0x1ce   : > { %v381_v16 = vpack.c.bf16 %v380_v14, %v379_v15 }
 0x1d0   : > { %644 = vmatmul.mubr.msk.bf16.vlgmr.msra.gmra.mrb[0].mxu1 %vm414_vm2, %v381_v16 }
 0x2a3   : > { %v452_v17 = vpop.f32.mrb[0].mxu1 }
 0x2a4   : > { %v645_v18 = vpop.f32.mrb[1].mxu1  ;;  %v472_v20 = vmul.f32 %v452_v17, %v452_v17 }
 0x2a5   : > { %v455_v19 = vpop.f32.mrb[2].mxu1 }
 0x2a6   : > { %v465_v21 = vadd.f32 %v455_v19, %v452_v17  ;;  %v473_v22 = vmul.f32 %v455_v19, %v455_v19  ;;  %v646_v23 = vpop.f32.mrb[3].mxu1 }
 0x2a8   : > { %v466_v24 = vrot.slane %v465_v21, 4  ;;  %v474_v25 = vadd.f32 %v473_v22, %v472_v20 }
 0x2aa   : > { %v467_v26 = vadd.f32 %v466_v24, %v465_v21  ;;  %v475_v27 = vrot.slane %v474_v25, 4 }
 0x2ac   : > { %v468_v28 = vrot.slane %v467_v26, 2  ;;  %v476_v29 = vadd.f32 %v475_v27, %v474_v25 }
 0x2ae   : > { %v469_v30 = vadd.f32 %v468_v28, %v467_v26  ;;  %v477_v31 = vrot.slane %v476_v29, 2 }
 0x2b0   : > { %v470_v32 = vrot.slane %v469_v30, 1  ;;  %v478_v33 = vadd.f32 %v477_v31, %v476_v29 }
 0x2b2   : > { %v479_v34 = vrot.slane %v478_v33, 1  ;;  %v471_v35 = vadd.f32 %v470_v32, %v469_v30 }
 0x2b4   : > { %v480_v36 = vadd.f32 %v479_v34, %v478_v33 }
 0x2b6   : > { %v482_v38 = vsel %vm481_vm3, %v471_v35, %v480_v36 }
 0x2b7   : > { %v483_v39 = vadd.f32 %v482_v38, %v464_v37 }
 0x2b9   : > { %484 = vst [vmem:[%s1139_s29] sm:$0x3] %v483_v39 }
 0x2ba   : > { %837 = shalt.err (!%p834_p5)
}
 0x2bb   : > { %s838_s21 = scalar_lea.hbm %s1148_s7, 32  ;;  %s842_s23 = scalar_lea.hbm %s1202_s4, 64 }
 0x2bc   : > { %p839_p10 = scmp.ne.s32.totalorder %s1148_s7, %s838_s21  ;;  %p843_p7 = scmp.lt.u32.totalorder %s1148_s7, %s1202_s4 }
 0x2bd   : > { %p844_p3 = scmp.lt.u32.totalorder %s842_s23, %s838_s21  ;;  %p846_p11 = scmp.lt.u32.totalorder %s838_s21, %s1148_s7 }
 0x2be   : > { %p840_p13 = pnand %p839_p10, %p1071_p8 }
 0x2bf   : > { %p845_p1 = por %p844_p3, %p843_p7 }
 0x2c0   : > { %p841_p9 = pneg %p840_p13 }
 0x2c1   : > { %p847_p4 = por %p846_p11, %p845_p1 }
 0x2c3   : > { %p848_p2 = pnand %p847_p4, %p841_p9 }
 0x2c5   : > { %851 = shalt.err (!%p848_p2)
}
 0x2c6   : > { %657 = dma.vmem_to_hbm [thread:$0]  (%p1071_p8), %s1150_s13, 32, %s1148_s7, %s486_s11  }
 0x2c7 PF: > { %s511_s29 = sand.u32 1, %s890_s15   ;;  %p1219_p6 = scmp.ne.s32.totalorder %s1210_s26, 0 }
 0x2c8   : > { %p1220_p12 = scmp.ge.s32.totalorder %s910_s20, 2  ;;  %s512_s12 = scalar_lea.sflag [#allocation4], %s511_s29 }
 0x2ca   : > { %p671_p0 = pnand %p1220_p12, %p1219_p6 }
 0x2cc   : > { %885 = dma.done.wait (!%p671_p0), %s512_s12, 32  }
 0x2cd   : > { %887 = vsyncadd (!%p671_p0), %s512_s12, 4294967264  ;;  %s21_s20 = sadd.s32 1, %s910_s20   ;;  %s1221_s15 = smov %s894_s16 }
 0x2ce   : > { %p18_p5 = scmp.ge.s32.totalorder %s21_s20, 4   ;;  %s1222_s16 = smov %s898_s17 }
 0x2cf   : > { %s1223_s17 = smov %s1080_s9  ;;  %s1224_s18 = smov %s906_s19 }
 0x2d0   : > { %s1225_s19 = smov %s1227_s22  ;;  %20 = sbr.rel (!%p18_p5) target bundleno = 7 (0x7), region = 93 }
 0x2d7   :  { %517 = vsyncpa [#allocation3], 1 }
 0x2d8   :  { %519 = vsyncpa [#allocation3 + $0x1], 1 }
 0x2d9   :  { %520 = vsyncpa [#allocation6], 1 }
 0x2da   :  { %521 = vsyncpa [#allocation4], 1 }
 0x2db   :  { %523 = vsyncpa [#allocation4 + $0x1], 1 }

</bundles_post_ra>
